<compile_context>
chip_gen: v5e
topology: v5e:2x2
jax: 0.10.0
libtpu: 0.0.40
codegen_flags: <defaults>
</compile_context>

<pallas_src>
import functools
import math

import numpy as np
import jax
import jax.numpy as jnp
from jax.experimental import pallas as pl
from jax.experimental.pallas import tpu as pltpu

B, T, H = 2, 8, 32          # batch, seq length, hidden size
BT = B * T
VOCAB = 16                  # categorical feature vocabulary
FF = 4 * H                  # transformer MLP width

STRATEGY = "trx_stat_out"   # hparams.inference_pooling_strategy (static)
NORM_PREDICT = True         # hparams.norm_predict (static)

_FEAT_DIM = {"trx_stat_out": 5 * H, "trx_stat": 4 * H, "out_stat": 4 * H, "out": H}


def _pad128(n):
    return ((n + 127) // 128) * 128


def _align8(n):
    return ((n + 7) // 8) * 8


# f32 parameter/constant slab row offsets (lane width = H)
R_BIAS = 0                                  # rows [0, BT): causal bias (cols [0, BT))
R_EMB = _align8(R_BIAS + BT)                # rows [R_EMB, R_EMB+VOCAB+1): [emb ; w_amt]
R_VEC = _align8(R_EMB + VOCAB + 1)          # rows R_VEC..R_VEC+4: b_trx, g1, b1, g2, b2
R_TFLAT = _align8(R_VEC + 8)                # rows [R_TFLAT, R_TFLAT+BT): position-in-seq
PSLAB_ROWS = _align8(R_TFLAT + BT)

OUT_ROWS = _align8(B)                       # pad output rows to full sublane tile


def _vmem():
    return pl.BlockSpec(memory_space=pltpu.MemorySpace.VMEM)


def _layer_norm(v, g, b):
    mu = jnp.mean(v, axis=-1, keepdims=True)
    var = jnp.mean((v - mu) ** 2, axis=-1, keepdims=True)
    return (v - mu) * jax.lax.rsqrt(var + 1e-5) * g + b


# ---------------------------------------------------------------------------
# Fused kernel: trx_encoder + GPT block + inference head
# ---------------------------------------------------------------------------
def gpt_inference_kernel(mcc_ref, dynf_ref, pslab_ref, wsmall_ref, wwide_ref,
                         o_ref, *, strategy, norm_predict):
    f32, bf16 = jnp.float32, jnp.bfloat16

    # ----- unpack packed parameter slabs (static, tile-aligned slices) -----
    bias = pslab_ref[R_BIAS:R_BIAS + BT, 0:BT]            # (BT,BT) additive causal bias
    emb_amt = pslab_ref[R_EMB:R_EMB + VOCAB + 1, :]       # (VOCAB+1, H) = [emb ; w_amt]
    vecs = pslab_ref[R_VEC:R_VEC + 8, :]                  # (8, H) small vectors
    b_trx, g1, b1, g2, b2 = (vecs[0:1], vecs[1:2], vecs[2:3], vecs[3:4], vecs[4:5])
    t_flat = pslab_ref[R_TFLAT:R_TFLAT + BT, 0:1]         # (BT,1) position within sequence

    wq = wsmall_ref[0 * H:1 * H, :]                       # (H,H) bf16, 1/sqrt(H) folded in
    wk = wsmall_ref[1 * H:2 * H, :]
    wv = wsmall_ref[2 * H:3 * H, :]
    wo = wsmall_ref[3 * H:4 * H, :]
    w2 = wsmall_ref[4 * H:4 * H + FF, :]                  # (FF,H) bf16
    w1 = wwide_ref[...]                                   # (H,FF) bf16

    mcc = mcc_ref[...]                                    # (BT,1) int32
    amt = dynf_ref[0:BT, :]                               # (BT,1) f32 numeric feature
    lens_rows = dynf_ref[BT:2 * BT, :]                    # (BT,1) f32 seq_len per row

    # ----- trx_encoder: fused [one_hot(mcc) | amount] @ [emb ; w_amt] + b ---
    col = jax.lax.broadcasted_iota(jnp.int32, (BT, VOCAB + 1), 1)
    oh = jnp.where(col == mcc, 1.0, 0.0).astype(f32)
    oh = jnp.where(col == VOCAB, amt, oh)                 # numeric feature -> last column
    # TODO(synk): default MXU f32 precision may round emb values (not bit-exact lookup).
    z = jnp.dot(oh, emb_amt, preferred_element_type=f32) + b_trx        # (BT,H)

    # ----- _seq_encoder: one pre-LN causal GPT block (flat over B*T) -------
    h = _layer_norm(z, g1, b1)
    h_b = h.astype(bf16)                                  # cast once, reused for Q/K/V
    q = jnp.dot(h_b, wq, preferred_element_type=f32)
    k = jnp.dot(h_b, wk, preferred_element_type=f32)
    v = jnp.dot(h_b, wv, preferred_element_type=f32)

    # flat block-diagonal causal attention (exactly per-batch causal attention)
    s = jax.lax.dot_general(q.astype(bf16), k.astype(bf16),
                            (((1,), (1,)), ((), ())),
                            preferred_element_type=f32)   # (BT,BT)
    s = s + bias
    s = s - jnp.max(s, axis=-1, keepdims=True)
    p = jnp.exp(s)
    p = p * pl.reciprocal(jnp.sum(p, axis=-1, keepdims=True), approx=True)
    ctx = jnp.dot(p.astype(bf16), v.astype(bf16), preferred_element_type=f32)
    x = z + jnp.dot(ctx.astype(bf16), wo, preferred_element_type=f32)

    h2 = _layer_norm(x, g2, b2)
    m = jnp.dot(h2.astype(bf16), w1, preferred_element_type=f32)        # (BT,FF)
    # TODO(synk): tanh-approximate GELU vs torch.nn.GELU exact-erf default.
    m = jax.nn.gelu(m)
    x = x + jnp.dot(m.astype(bf16), w2, preferred_element_type=f32)     # seq_out (BT,H)

    # ----- inference head: StatPooling + LastStepEncoder + cat + L2-norm ---
    valid3 = (t_flat < lens_rows).astype(f32).reshape(B, T, 1)
    last3 = (t_flat == lens_rows - 1.0).astype(f32).reshape(B, T, 1)
    count = jnp.sum(valid3, axis=1)                       # (B,1) valid steps
    count_safe = jnp.maximum(count, 1.0)
    has = jnp.where(count > 0.0, 1.0, 0.0)                # guard len == 0

    def stat_pool(v2):
        # TODO(synk): exact ptls StatPooling statistic set/order approximated as
        # masked [mean, unbiased std, max, min].
        v3r = v2.reshape(B, T, H)
        v3 = v3r * valid3
        mean = jnp.sum(v3, axis=1) / count_safe
        d = (v3r - mean[:, None, :]) * valid3
        var = jnp.sum(d * d, axis=1) / jnp.maximum(count - 1.0, 1.0)
        std = jnp.sqrt(var)
        big = (1.0 - valid3) * 1e30
        v_max = jnp.max(v3r - big, axis=1) * has
        v_min = jnp.min(v3r + big, axis=1) * has
        return jnp.concatenate([mean, std, v_max, v_min], axis=-1)      # (B,4H)

    def last_step(v2):
        return jnp.sum(v2.reshape(B, T, H) * last3, axis=1)             # (B,H)

    if strategy == "trx_stat_out":
        feat = jnp.concatenate([stat_pool(z), last_step(x)], axis=-1)
    elif strategy == "trx_stat":
        feat = stat_pool(z)
    elif strategy == "out_stat":
        feat = stat_pool(x)
    elif strategy == "out":
        feat = last_step(x)
    else:
        raise ValueError(strategy)

    if norm_predict:
        # out / (sum(out^2) + 1e-9)^0.5  (matches the module)
        feat = feat * jax.lax.rsqrt(jnp.sum(feat * feat, axis=-1, keepdims=True) + 1e-9)

    # pad to a full (8, k*128) tile so the store is lane/sublane dense;
    # zero rows/cols are sliced off in the wrapper and do not perturb the norm.
    out_rows, out_cols = o_ref.shape
    lane_pad = out_cols - feat.shape[-1]
    if lane_pad:
        feat = jnp.concatenate([feat, jnp.zeros((B, lane_pad), f32)], axis=-1)
    row_pad = out_rows - B
    if row_pad:
        feat = jnp.concatenate([feat, jnp.zeros((row_pad, out_cols), f32)], axis=0)
    o_ref[...] = feat


# ---------------------------------------------------------------------------
# Wrapper: single fused pallas_call (no grid, everything resident in VMEM)
# ---------------------------------------------------------------------------
@functools.partial(jax.jit, static_argnames=("strategy", "norm_predict"))
def gpt_inference_module(mcc, amount, seq_lens, pslab, wsmall, wwide,
                         strategy=STRATEGY, norm_predict=NORM_PREDICT):
    feat_dim = _FEAT_DIM[strategy]
    out_pad = _pad128(feat_dim)
    lens_f = seq_lens.astype(jnp.float32)[:, None]                      # (B,1)
    lens_rows = jnp.broadcast_to(lens_f, (B, T)).reshape(BT, 1)         # (BT,1)
    dynf = jnp.concatenate(
        [amount.reshape(BT, 1).astype(jnp.float32), lens_rows], axis=0)  # (2*BT,1)
    kern = functools.partial(gpt_inference_kernel, strategy=strategy,
                             norm_predict=norm_predict)
    out = pl.pallas_call(
        kern,
        out_shape=jax.ShapeDtypeStruct((OUT_ROWS, out_pad), jnp.float32),
        in_specs=[_vmem()] * 5,
        out_specs=_vmem(),
    )(mcc.reshape(BT, 1).astype(jnp.int32), dynf, pslab, wsmall, wwide)
    return out[:B, :feat_dim]


# ---------------------------------------------------------------------------
# Deterministic parameter initialization + one-time packing into slabs
# ---------------------------------------------------------------------------
def init_params(key):
    ks = jax.random.split(key, 8)
    s = 0.02
    return {
        "emb":   jax.random.normal(ks[0], (VOCAB, H), jnp.float32) * s,
        "w_amt": jax.random.normal(ks[1], (1, H), jnp.float32) * s,
        "b_trx": jnp.zeros((1, H), jnp.float32),
        "wq": jax.random.normal(ks[2], (H, H), jnp.float32) * s,
        "wk": jax.random.normal(ks[3], (H, H), jnp.float32) * s,
        "wv": jax.random.normal(ks[4], (H, H), jnp.float32) * s,
        "wo": jax.random.normal(ks[5], (H, H), jnp.float32) * s,
        "w1": jax.random.normal(ks[6], (H, FF), jnp.float32) * s,
        "w2": jax.random.normal(ks[7], (FF, H), jnp.float32) * s,
        "g1": jnp.ones((1, H), jnp.float32),
        "b1": jnp.zeros((1, H), jnp.float32),
        "g2": jnp.ones((1, H), jnp.float32),
        "b2": jnp.zeros((1, H), jnp.float32),
    }


def pack_params(params):
    """One-time packing: f32 params + static constants -> one slab; all MXU
    weights pre-cast to bf16 -> two row-aligned slabs (done outside the hot path)."""
    assert BT <= H, "pslab layout assumes B*T <= H lanes"
    ps = np.zeros((PSLAB_ROWS, H), np.float32)
    # block-diagonal causal additive bias over the flat (B*T) axis
    r = np.arange(BT)[:, None]
    c = np.arange(BT)[None, :]
    allowed = (r // T == c // T) & (c <= r)
    ps[R_BIAS:R_BIAS + BT, :BT] = np.where(allowed, 0.0, -1e30)
    ps[R_EMB:R_EMB + VOCAB, :] = np.asarray(params["emb"])
    ps[R_EMB + VOCAB, :] = np.asarray(params["w_amt"])[0]
    for i, name in enumerate(("b_trx", "g1", "b1", "g2", "b2")):
        ps[R_VEC + i, :] = np.asarray(params[name])[0]
    ps[R_TFLAT:R_TFLAT + BT, 0] = np.arange(BT) % T
    pslab = jnp.asarray(ps)

    wsmall = jnp.concatenate(
        [params["wq"] * (1.0 / math.sqrt(H)),     # attention scale folded into Q
         params["wk"], params["wv"], params["wo"], params["w2"]],
        axis=0).astype(jnp.bfloat16)              # (4H+FF, H) bf16
    wwide = params["w1"].astype(jnp.bfloat16)     # (H, FF) bf16
    return pslab, wsmall, wwide


if __name__ == "__main__":
    key = jax.random.PRNGKey(0)
    pkey, k_mcc, k_amt = jax.random.split(key, 3)
    params = init_params(pkey)
    pslab, wsmall, wwide = pack_params(params)

    mcc = jax.random.randint(k_mcc, (B, T), 0, VOCAB)               # categorical feature
    amount = jax.random.normal(k_amt, (B, T), jnp.float32)          # numeric feature
    seq_lens = jnp.array([T, 5], dtype=jnp.int32)                   # PaddedBatch.seq_lens

    out = gpt_inference_module(mcc, amount, seq_lens, pslab, wsmall, wwide)
    out = jax.block_until_ready(out)
    assert out.shape == (B, _FEAT_DIM[STRATEGY]) and out.dtype == jnp.float32
    assert bool(jnp.all(jnp.isfinite(out)))
    print("KERNEL_OK")
</pallas_src>

<mosaic_0001>
module attributes {stable_mosaic.version = 11 : i64} {
  func.func @gpt_inference_kernel(%arg0: memref<16x1xi32, #tpu.memory_space<vmem>>, %arg1: memref<32x1xf32, #tpu.memory_space<vmem>>, %arg2: memref<64x32xf32, #tpu.memory_space<vmem>>, %arg3: memref<256x32xbf16, #tpu.memory_space<vmem>>, %arg4: memref<32x128xbf16, #tpu.memory_space<vmem>>, %arg5: memref<8x256xf32, #tpu.memory_space<vmem>>) attributes {dimension_semantics = [], scalar_prefetch = 0 : i64, scratch_operands = 0 : i64, tpu.core_type = #tpu.core_type<tc>} {
    %c0 = arith.constant 0 : index
    %c0_0 = arith.constant 0 : index
    %0 = vector.load %arg2[%c0, %c0_0] : memref<64x32xf32, #tpu.memory_space<vmem>>, vector<16x16xf32>
    %c16 = arith.constant 16 : index
    %c0_1 = arith.constant 0 : index
    %1 = vector.load %arg2[%c16, %c0_1] : memref<64x32xf32, #tpu.memory_space<vmem>>, vector<17x32xf32>
    %c40 = arith.constant 40 : index
    %c0_2 = arith.constant 0 : index
    %2 = vector.load %arg2[%c40, %c0_2] : memref<64x32xf32, #tpu.memory_space<vmem>>, vector<8x32xf32>
    %3 = vector.extract_strided_slice %2 {offsets = [0, 0], sizes = [1, 32], strides = [1, 1]} : vector<8x32xf32> to vector<1x32xf32>
    %4 = vector.extract_strided_slice %2 {offsets = [1, 0], sizes = [1, 32], strides = [1, 1]} : vector<8x32xf32> to vector<1x32xf32>
    %5 = vector.extract_strided_slice %2 {offsets = [2, 0], sizes = [1, 32], strides = [1, 1]} : vector<8x32xf32> to vector<1x32xf32>
    %6 = vector.extract_strided_slice %2 {offsets = [3, 0], sizes = [1, 32], strides = [1, 1]} : vector<8x32xf32> to vector<1x32xf32>
    %7 = vector.extract_strided_slice %2 {offsets = [4, 0], sizes = [1, 32], strides = [1, 1]} : vector<8x32xf32> to vector<1x32xf32>
    %c48 = arith.constant 48 : index
    %c0_3 = arith.constant 0 : index
    %8 = vector.load %arg2[%c48, %c0_3] : memref<64x32xf32, #tpu.memory_space<vmem>>, vector<16x1xf32>
    %c0_4 = arith.constant 0 : index
    %c0_5 = arith.constant 0 : index
    %9 = vector.load %arg3[%c0_4, %c0_5] : memref<256x32xbf16, #tpu.memory_space<vmem>>, vector<32x32xbf16>
    %c32 = arith.constant 32 : index
    %c0_6 = arith.constant 0 : index
    %10 = vector.load %arg3[%c32, %c0_6] : memref<256x32xbf16, #tpu.memory_space<vmem>>, vector<32x32xbf16>
    %c64 = arith.constant 64 : index
    %c0_7 = arith.constant 0 : index
    %11 = vector.load %arg3[%c64, %c0_7] : memref<256x32xbf16, #tpu.memory_space<vmem>>, vector<32x32xbf16>
    %c96 = arith.constant 96 : index
    %c0_8 = arith.constant 0 : index
    %12 = vector.load %arg3[%c96, %c0_8] : memref<256x32xbf16, #tpu.memory_space<vmem>>, vector<32x32xbf16>
    %c128 = arith.constant 128 : index
    %c0_9 = arith.constant 0 : index
    %13 = vector.load %arg3[%c128, %c0_9] : memref<256x32xbf16, #tpu.memory_space<vmem>>, vector<128x32xbf16>
    %c0_10 = arith.constant 0 : index
    %c0_11 = arith.constant 0 : index
    %14 = vector.load %arg4[%c0_10, %c0_11] : memref<32x128xbf16, #tpu.memory_space<vmem>>, vector<32x128xbf16>
    %c0_12 = arith.constant 0 : index
    %c0_13 = arith.constant 0 : index
    %15 = vector.load %arg0[%c0_12, %c0_13] : memref<16x1xi32, #tpu.memory_space<vmem>>, vector<16x1xi32>
    %c0_14 = arith.constant 0 : index
    %c0_15 = arith.constant 0 : index
    %16 = vector.load %arg1[%c0_14, %c0_15] : memref<32x1xf32, #tpu.memory_space<vmem>>, vector<16x1xf32>
    %c16_16 = arith.constant 16 : index
    %c0_17 = arith.constant 0 : index
    %17 = vector.load %arg1[%c16_16, %c0_17] : memref<32x1xf32, #tpu.memory_space<vmem>>, vector<16x1xf32>
    %18 = tpu.iota {dimensions = array<i32: 1>} : vector<16x17xi32>
    %19 = vector.broadcast %15 : vector<16x1xi32> to vector<16x17xi32>
    %20 = arith.cmpi eq, %18, %19 : vector<16x17xi32>
    %cst = arith.constant 1.000000e+00 : f32
    %cst_18 = arith.constant 0.000000e+00 : f32
    %21 = vector.broadcast %cst : f32 to vector<16x17xf32>
    %22 = vector.broadcast %cst_18 : f32 to vector<16x17xf32>
    %23 = arith.select %20, %21, %22 : vector<16x17xi1>, vector<16x17xf32>
    %c16_i32 = arith.constant 16 : i32
    %24 = vector.broadcast %c16_i32 : i32 to vector<16x17xi32>
    %25 = arith.cmpi eq, %18, %24 : vector<16x17xi32>
    %26 = vector.shape_cast %16 : vector<16x1xf32> to vector<16x1xf32>
    %27 = vector.broadcast %26 : vector<16x1xf32> to vector<16x17xf32>
    %28 = arith.select %25, %27, %23 : vector<16x17xi1>, vector<16x17xf32>
    %cst_19 = arith.constant dense<0.000000e+00> : vector<16x32xf32>
    %29 = tpu.matmul %28, %1, %cst_19 {dimension_numbers = #tpu.dot_dimension_numbers<[1], [0], [0], [1], [0, 0, 1, 1], [], []>} : vector<16x17xf32>, vector<17x32xf32>, vector<16x32xf32> -> vector<16x32xf32>
    %30 = vector.broadcast %3 : vector<1x32xf32> to vector<16x32xf32>
    %31 = arith.addf %29, %30 : vector<16x32xf32>
    %cst_20 = arith.constant dense<0.000000e+00> : vector<16xf32>
    %32 = vector.multi_reduction <add>, %31, %cst_20 [1] : vector<16x32xf32> to vector<16xf32>
    %33 = vector.shape_cast %32 : vector<16xf32> to vector<16x1xf32>
    %cst_21 = arith.constant 3.200000e+01 : f32
    %34 = vector.broadcast %cst_21 : f32 to vector<16x1xf32>
    %35 = arith.divf %33, %34 : vector<16x1xf32>
    %36 = vector.broadcast %35 : vector<16x1xf32> to vector<16x32xf32>
    %37 = arith.subf %31, %36 : vector<16x32xf32>
    %38 = arith.mulf %37, %37 : vector<16x32xf32>
    %cst_22 = arith.constant dense<0.000000e+00> : vector<16xf32>
    %39 = vector.multi_reduction <add>, %38, %cst_22 [1] : vector<16x32xf32> to vector<16xf32>
    %40 = vector.shape_cast %39 : vector<16xf32> to vector<16x1xf32>
    %cst_23 = arith.constant 3.200000e+01 : f32
    %41 = vector.broadcast %cst_23 : f32 to vector<16x1xf32>
    %42 = arith.divf %40, %41 : vector<16x1xf32>
    %43 = vector.broadcast %35 : vector<16x1xf32> to vector<16x32xf32>
    %44 = arith.subf %31, %43 : vector<16x32xf32>
    %cst_24 = arith.constant 9.99999974E-6 : f32
    %45 = vector.broadcast %cst_24 : f32 to vector<16x1xf32>
    %46 = arith.addf %42, %45 : vector<16x1xf32>
    %47 = math.rsqrt %46 : vector<16x1xf32>
    %48 = vector.broadcast %47 : vector<16x1xf32> to vector<16x32xf32>
    %49 = arith.mulf %44, %48 : vector<16x32xf32>
    %50 = vector.broadcast %4 : vector<1x32xf32> to vector<16x32xf32>
    %51 = arith.mulf %49, %50 : vector<16x32xf32>
    %52 = vector.broadcast %5 : vector<1x32xf32> to vector<16x32xf32>
    %53 = arith.addf %51, %52 : vector<16x32xf32>
    %54 = arith.truncf %53 : vector<16x32xf32> to vector<16x32xbf16>
    %cst_25 = arith.constant dense<0.000000e+00> : vector<16x32xf32>
    %55 = tpu.matmul %54, %9, %cst_25 {dimension_numbers = #tpu.dot_dimension_numbers<[1], [0], [0], [1], [0, 0, 1, 1], [], []>} : vector<16x32xbf16>, vector<32x32xbf16>, vector<16x32xf32> -> vector<16x32xf32>
    %cst_26 = arith.constant dense<0.000000e+00> : vector<16x32xf32>
    %56 = tpu.matmul %54, %10, %cst_26 {dimension_numbers = #tpu.dot_dimension_numbers<[1], [0], [0], [1], [0, 0, 1, 1], [], []>} : vector<16x32xbf16>, vector<32x32xbf16>, vector<16x32xf32> -> vector<16x32xf32>
    %cst_27 = arith.constant dense<0.000000e+00> : vector<16x32xf32>
    %57 = tpu.matmul %54, %11, %cst_27 {dimension_numbers = #tpu.dot_dimension_numbers<[1], [0], [0], [1], [0, 0, 1, 1], [], []>} : vector<16x32xbf16>, vector<32x32xbf16>, vector<16x32xf32> -> vector<16x32xf32>
    %58 = arith.truncf %55 : vector<16x32xf32> to vector<16x32xbf16>
    %59 = arith.truncf %56 : vector<16x32xf32> to vector<16x32xbf16>
    %cst_28 = arith.constant dense<0.000000e+00> : vector<16x16xf32>
    %60 = tpu.matmul %58, %59, %cst_28 {dimension_numbers = #tpu.dot_dimension_numbers<[1], [1], [0], [0], [0, 0, 1, 0], [], []>} : vector<16x32xbf16>, vector<16x32xbf16>, vector<16x16xf32> -> vector<16x16xf32>
    %61 = arith.addf %60, %0 : vector<16x16xf32>
    %cst_29 = arith.constant dense<0xFF800000> : vector<16xf32>
    %62 = vector.multi_reduction <maximumf>, %61, %cst_29 [1] : vector<16x16xf32> to vector<16xf32>
    %63 = vector.shape_cast %62 : vector<16xf32> to vector<16x1xf32>
    %64 = vector.broadcast %63 : vector<16x1xf32> to vector<16x16xf32>
    %65 = arith.subf %61, %64 : vector<16x16xf32>
    %66 = math.exp %65 : vector<16x16xf32>
    %cst_30 = arith.constant dense<0.000000e+00> : vector<16xf32>
    %67 = vector.multi_reduction <add>, %66, %cst_30 [1] : vector<16x16xf32> to vector<16xf32>
    %68 = vector.shape_cast %67 : vector<16xf32> to vector<16x1xf32>
    %69 = tpu.reciprocal %68 {approx = true} : vector<16x1xf32> -> vector<16x1xf32>
    %70 = vector.broadcast %69 : vector<16x1xf32> to vector<16x16xf32>
    %71 = arith.mulf %66, %70 : vector<16x16xf32>
    %72 = arith.truncf %71 : vector<16x16xf32> to vector<16x16xbf16>
    %73 = arith.truncf %57 : vector<16x32xf32> to vector<16x32xbf16>
    %cst_31 = arith.constant dense<0.000000e+00> : vector<16x32xf32>
    %74 = tpu.matmul %72, %73, %cst_31 {dimension_numbers = #tpu.dot_dimension_numbers<[1], [0], [0], [1], [0, 0, 1, 1], [], []>} : vector<16x16xbf16>, vector<16x32xbf16>, vector<16x32xf32> -> vector<16x32xf32>
    %75 = arith.truncf %74 : vector<16x32xf32> to vector<16x32xbf16>
    %cst_32 = arith.constant dense<0.000000e+00> : vector<16x32xf32>
    %76 = tpu.matmul %75, %12, %cst_32 {dimension_numbers = #tpu.dot_dimension_numbers<[1], [0], [0], [1], [0, 0, 1, 1], [], []>} : vector<16x32xbf16>, vector<32x32xbf16>, vector<16x32xf32> -> vector<16x32xf32>
    %77 = arith.addf %31, %76 : vector<16x32xf32>
    %cst_33 = arith.constant dense<0.000000e+00> : vector<16xf32>
    %78 = vector.multi_reduction <add>, %77, %cst_33 [1] : vector<16x32xf32> to vector<16xf32>
    %79 = vector.shape_cast %78 : vector<16xf32> to vector<16x1xf32>
    %cst_34 = arith.constant 3.200000e+01 : f32
    %80 = vector.broadcast %cst_34 : f32 to vector<16x1xf32>
    %81 = arith.divf %79, %80 : vector<16x1xf32>
    %82 = vector.broadcast %81 : vector<16x1xf32> to vector<16x32xf32>
    %83 = arith.subf %77, %82 : vector<16x32xf32>
    %84 = arith.mulf %83, %83 : vector<16x32xf32>
    %cst_35 = arith.constant dense<0.000000e+00> : vector<16xf32>
    %85 = vector.multi_reduction <add>, %84, %cst_35 [1] : vector<16x32xf32> to vector<16xf32>
    %86 = vector.shape_cast %85 : vector<16xf32> to vector<16x1xf32>
    %cst_36 = arith.constant 3.200000e+01 : f32
    %87 = vector.broadcast %cst_36 : f32 to vector<16x1xf32>
    %88 = arith.divf %86, %87 : vector<16x1xf32>
    %89 = vector.broadcast %81 : vector<16x1xf32> to vector<16x32xf32>
    %90 = arith.subf %77, %89 : vector<16x32xf32>
    %cst_37 = arith.constant 9.99999974E-6 : f32
    %91 = vector.broadcast %cst_37 : f32 to vector<16x1xf32>
    %92 = arith.addf %88, %91 : vector<16x1xf32>
    %93 = math.rsqrt %92 : vector<16x1xf32>
    %94 = vector.broadcast %93 : vector<16x1xf32> to vector<16x32xf32>
    %95 = arith.mulf %90, %94 : vector<16x32xf32>
    %96 = vector.broadcast %6 : vector<1x32xf32> to vector<16x32xf32>
    %97 = arith.mulf %95, %96 : vector<16x32xf32>
    %98 = vector.broadcast %7 : vector<1x32xf32> to vector<16x32xf32>
    %99 = arith.addf %97, %98 : vector<16x32xf32>
    %100 = arith.truncf %99 : vector<16x32xf32> to vector<16x32xbf16>
    %cst_38 = arith.constant dense<0.000000e+00> : vector<16x128xf32>
    %101 = tpu.matmul %100, %14, %cst_38 {dimension_numbers = #tpu.dot_dimension_numbers<[1], [0], [0], [1], [0, 0, 1, 1], [], []>} : vector<16x32xbf16>, vector<32x128xbf16>, vector<16x128xf32> -> vector<16x128xf32>
    %102 = arith.mulf %101, %101 : vector<16x128xf32>
    %103 = arith.mulf %101, %102 : vector<16x128xf32>
    %cst_39 = arith.constant 4.471500e-02 : f32
    %104 = vector.broadcast %cst_39 : f32 to vector<16x128xf32>
    %105 = arith.mulf %104, %103 : vector<16x128xf32>
    %106 = arith.addf %101, %105 : vector<16x128xf32>
    %cst_40 = arith.constant 0.797884583 : f32
    %107 = vector.broadcast %cst_40 : f32 to vector<16x128xf32>
    %108 = arith.mulf %107, %106 : vector<16x128xf32>
    %109 = math.tanh %108 : vector<16x128xf32>
    %cst_41 = arith.constant 1.000000e+00 : f32
    %110 = vector.broadcast %cst_41 : f32 to vector<16x128xf32>
    %111 = arith.addf %110, %109 : vector<16x128xf32>
    %cst_42 = arith.constant 5.000000e-01 : f32
    %112 = vector.broadcast %cst_42 : f32 to vector<16x128xf32>
    %113 = arith.mulf %112, %111 : vector<16x128xf32>
    %114 = arith.mulf %101, %113 : vector<16x128xf32>
    %115 = arith.truncf %114 : vector<16x128xf32> to vector<16x128xbf16>
    %cst_43 = arith.constant dense<0.000000e+00> : vector<16x32xf32>
    %116 = tpu.matmul %115, %13, %cst_43 {dimension_numbers = #tpu.dot_dimension_numbers<[1], [0], [0], [1], [0, 0, 1, 1], [], []>} : vector<16x128xbf16>, vector<128x32xbf16>, vector<16x32xf32> -> vector<16x32xf32>
    %117 = arith.addf %77, %116 : vector<16x32xf32>
    %118 = arith.cmpf olt, %8, %17 : vector<16x1xf32>
    %119 = arith.extui %118 : vector<16x1xi1> to vector<16x1xi32>
    %120 = arith.sitofp %119 : vector<16x1xi32> to vector<16x1xf32>
    %121 = vector.shape_cast %120 : vector<16x1xf32> to vector<2x8x1xf32>
    %cst_44 = arith.constant 1.000000e+00 : f32
    %122 = vector.broadcast %cst_44 : f32 to vector<16x1xf32>
    %123 = arith.subf %17, %122 : vector<16x1xf32>
    %124 = arith.cmpf oeq, %8, %123 : vector<16x1xf32>
    %125 = arith.extui %124 : vector<16x1xi1> to vector<16x1xi32>
    %126 = arith.sitofp %125 : vector<16x1xi32> to vector<16x1xf32>
    %127 = vector.shape_cast %126 : vector<16x1xf32> to vector<2x8x1xf32>
    %cst_45 = arith.constant dense<0.000000e+00> : vector<2x1xf32>
    %128 = vector.multi_reduction <add>, %121, %cst_45 [1] : vector<2x8x1xf32> to vector<2x1xf32>
    %cst_46 = arith.constant 1.000000e+00 : f32
    %129 = vector.broadcast %cst_46 : f32 to vector<2x1xf32>
    %130 = arith.maximumf %128, %129 : vector<2x1xf32>
    %cst_47 = arith.constant 0.000000e+00 : f32
    %131 = vector.broadcast %cst_47 : f32 to vector<2x1xf32>
    %132 = arith.cmpf ogt, %128, %131 : vector<2x1xf32>
    %cst_48 = arith.constant 1.000000e+00 : f32
    %cst_49 = arith.constant 0.000000e+00 : f32
    %133 = vector.broadcast %cst_48 : f32 to vector<2x1xf32>
    %134 = vector.broadcast %cst_49 : f32 to vector<2x1xf32>
    %135 = arith.select %132, %133, %134 : vector<2x1xi1>, vector<2x1xf32>
    %136 = vector.shape_cast %31 : vector<16x32xf32> to vector<2x8x32xf32>
    %137 = vector.broadcast %121 : vector<2x8x1xf32> to vector<2x8x32xf32>
    %138 = arith.mulf %136, %137 : vector<2x8x32xf32>
    %cst_50 = arith.constant dense<0.000000e+00> : vector<2x32xf32>
    %139 = vector.multi_reduction <add>, %138, %cst_50 [1] : vector<2x8x32xf32> to vector<2x32xf32>
    %140 = vector.broadcast %130 : vector<2x1xf32> to vector<2x32xf32>
    %141 = arith.divf %139, %140 : vector<2x32xf32>
    %142 = vector.shape_cast %141 : vector<2x32xf32> to vector<2x1x32xf32>
    %143 = vector.broadcast %142 : vector<2x1x32xf32> to vector<2x8x32xf32>
    %144 = arith.subf %136, %143 : vector<2x8x32xf32>
    %145 = vector.broadcast %121 : vector<2x8x1xf32> to vector<2x8x32xf32>
    %146 = arith.mulf %144, %145 : vector<2x8x32xf32>
    %147 = arith.mulf %146, %146 : vector<2x8x32xf32>
    %cst_51 = arith.constant dense<0.000000e+00> : vector<2x32xf32>
    %148 = vector.multi_reduction <add>, %147, %cst_51 [1] : vector<2x8x32xf32> to vector<2x32xf32>
    %cst_52 = arith.constant 1.000000e+00 : f32
    %149 = vector.broadcast %cst_52 : f32 to vector<2x1xf32>
    %150 = arith.subf %128, %149 : vector<2x1xf32>
    %cst_53 = arith.constant 1.000000e+00 : f32
    %151 = vector.broadcast %cst_53 : f32 to vector<2x1xf32>
    %152 = arith.maximumf %150, %151 : vector<2x1xf32>
    %153 = vector.broadcast %152 : vector<2x1xf32> to vector<2x32xf32>
    %154 = arith.divf %148, %153 : vector<2x32xf32>
    %155 = math.sqrt %154 : vector<2x32xf32>
    %cst_54 = arith.constant 1.000000e+00 : f32
    %156 = vector.broadcast %cst_54 : f32 to vector<2x8x1xf32>
    %157 = arith.subf %156, %121 : vector<2x8x1xf32>
    %cst_55 = arith.constant 1.000000e+30 : f32
    %158 = vector.broadcast %cst_55 : f32 to vector<2x8x1xf32>
    %159 = arith.mulf %157, %158 : vector<2x8x1xf32>
    %160 = vector.broadcast %159 : vector<2x8x1xf32> to vector<2x8x32xf32>
    %161 = arith.subf %136, %160 : vector<2x8x32xf32>
    %cst_56 = arith.constant dense<0xFF800000> : vector<2x32xf32>
    %162 = vector.multi_reduction <maximumf>, %161, %cst_56 [1] : vector<2x8x32xf32> to vector<2x32xf32>
    %163 = vector.broadcast %135 : vector<2x1xf32> to vector<2x32xf32>
    %164 = arith.mulf %162, %163 : vector<2x32xf32>
    %165 = vector.broadcast %159 : vector<2x8x1xf32> to vector<2x8x32xf32>
    %166 = arith.addf %136, %165 : vector<2x8x32xf32>
    %cst_57 = arith.constant dense<0x7F800000> : vector<2x32xf32>
    %167 = vector.multi_reduction <minimumf>, %166, %cst_57 [1] : vector<2x8x32xf32> to vector<2x32xf32>
    %168 = vector.broadcast %135 : vector<2x1xf32> to vector<2x32xf32>
    %169 = arith.mulf %167, %168 : vector<2x32xf32>
    %170 = tpu.concatenate %141, %155, %164, %169 in 1 : vector<2x32xf32>, vector<2x32xf32>, vector<2x32xf32>, vector<2x32xf32> -> vector<2x128xf32>
    %171 = vector.shape_cast %117 : vector<16x32xf32> to vector<2x8x32xf32>
    %172 = vector.broadcast %127 : vector<2x8x1xf32> to vector<2x8x32xf32>
    %173 = arith.mulf %171, %172 : vector<2x8x32xf32>
    %cst_58 = arith.constant dense<0.000000e+00> : vector<2x32xf32>
    %174 = vector.multi_reduction <add>, %173, %cst_58 [1] : vector<2x8x32xf32> to vector<2x32xf32>
    %175 = tpu.concatenate %170, %174 in 1 : vector<2x128xf32>, vector<2x32xf32> -> vector<2x160xf32>
    %176 = arith.mulf %175, %175 : vector<2x160xf32>
    %cst_59 = arith.constant dense<0.000000e+00> : vector<2xf32>
    %177 = vector.multi_reduction <add>, %176, %cst_59 [1] : vector<2x160xf32> to vector<2xf32>
    %178 = vector.shape_cast %177 : vector<2xf32> to vector<2x1xf32>
    %cst_60 = arith.constant 9.99999971E-10 : f32
    %179 = vector.broadcast %cst_60 : f32 to vector<2x1xf32>
    %180 = arith.addf %178, %179 : vector<2x1xf32>
    %181 = math.rsqrt %180 : vector<2x1xf32>
    %182 = vector.broadcast %181 : vector<2x1xf32> to vector<2x160xf32>
    %183 = arith.mulf %175, %182 : vector<2x160xf32>
    %cst_61 = arith.constant 0.000000e+00 : f32
    %184 = vector.broadcast %cst_61 : f32 to vector<2x96xf32>
    %185 = tpu.concatenate %183, %184 in 1 : vector<2x160xf32>, vector<2x96xf32> -> vector<2x256xf32>
    %cst_62 = arith.constant 0.000000e+00 : f32
    %186 = vector.broadcast %cst_62 : f32 to vector<6x256xf32>
    %187 = tpu.concatenate %185, %186 in 0 : vector<2x256xf32>, vector<6x256xf32> -> vector<8x256xf32>
    %c0_63 = arith.constant 0 : index
    %c0_64 = arith.constant 0 : index
    %188 = vector.load %arg5[%c0_63, %c0_64] : memref<8x256xf32, #tpu.memory_space<vmem>>, vector<8x256xf32>
    tpu.vector_store %arg5[%c0_63, %c0_64], %187 {strides = array<i32>} : memref<8x256xf32, #tpu.memory_space<vmem>>, vector<8x256xf32>,
    return
  }
}

</mosaic_0001>

<bundles_post_ra>
// kernel: gpt_inference_module.1
= control target key start
LH: loop header
LB: loop body
LE: loop exit
PB: predicated region body
PF: predicated region fallthrough
CT: control target
= control target key end

     0   :  { %v1036_v0 = vmov 0   ;;  %vm104_vm0 = vcmask 1040384   ;;  %v71_v8 = vlaneseq  ;;  %vm97_vm3 = vcmask 138240   ;;  %s1040_s12 = smov 96   ;;  %s1041_s13 = smov 32   ;;  %s1378_s0 = inlined_call_operand.vmem [shape: s32[16,1], index: 0, kind: input, shape index: {}]   ;;  %s1379_s1 = inlined_call_operand.vmem [shape: f32[32,1], index: 1, kind: input, shape index: {}]   ;;  %s1380_s2 = inlined_call_operand.vmem [shape: f32[64,32], index: 2, kind: input, shape index: {}]   ;;  %s1381_s3 = inlined_call_operand.vmem [shape: bf16[256,32], index: 3, kind: input, shape index: {}]   ;;  %s1382_s4 = inlined_call_operand.vmem [shape: bf16[32,128], index: 4, kind: input, shape index: {}]   ;;  %s1383_s5 = inlined_call_operand.vmem [shape: f32[8,256], index: 5, kind: output, shape index: {}]  }
   0x1   :  { %983 = vset.pattern.permute.xlu1 %v1036_v0  ;;  %982 = vset.pattern.permute.xlu0 %v1036_v0  ;;  %v66_v1 = vld [vmem:[%s1378_s0 + $0x8] sm:$0xff]  ;;  %v65_v2 = vld [vmem:[%s1378_s0] sm:$0xff]  ;;  %v24_v6 = vld [vmem:[%s1380_s2 + $0x18] sm:$0xff]  ;;  %v1037_v12 = vmov 0.0   ;;  %vm131_vm5 = vcmask 261120   ;;  %v1038_v27 = vmov 32.0  }
   0x2   :  { %77 = vperm.xlu1 %983, %v66_v1   ;;  %74 = vperm.xlu0 %982, %v65_v2   ;;  %v68_v3 = vld [vmem:[%s1379_s1 + $0x8] sm:$0xff]  ;;  %v67_v4 = vld [vmem:[%s1379_s1] sm:$0xff]  ;;  %v23_v7 = vld [vmem:[%s1380_s2 + $0x10] sm:$0xff]  ;;  %v72_v10 = vand.u32 127, %v71_v8  ;;  %1000 = vrcp.f32 %v1038_v27  ;;  %vm293_vm13 = vcmask 130048  }
   0x3   :  { %984 = vset.pattern.permute.xlu2 %v1036_v0  ;;  %v25_v5 = vld [vmem:[%s1380_s2 + $0x20] sm:$0x1]  ;;  %v1098_v19 = vld [vmem:[%s1380_s2 + $0x28] sm:$0xff]  ;;  %v961_v45 = vld [vmem:[%s1381_s3 + $0x18] sm:$0xff] }
   0x4   :  { %868 = vmatpush.msk.msra.mxu1 %vm104_vm0, %v25_v5  ;;  %vm83_vm2 = vcmp.eq.s32.totalorder %v72_v10, 16  ;;  %v96_v20 = vperm.slane %v1098_v19, 0  ;;  %v959_v44 = vld [vmem:[%s1381_s3 + $0x8] sm:$0xff]  ;;  %237 = vmatpush.bf16.msra.mxu2 %v961_v45  ;;  %v958_v48 = vld [vmem:[%s1381_s3] sm:$0xff]  ;;  %v960_v49 = vld [vmem:[%s1381_s3 + $0x10] sm:$0xff]  ;;  %v183_v5 = vperm.slane %v1098_v19, 1 }
   0x5   :  { %v963_v46 = vld [vmem:[%s1381_s3 + $0x28] sm:$0xff]  ;;  %v962_v51 = vld [vmem:[%s1381_s3 + $0x20] sm:$0xff]  ;;  %vm544_vm0 = vcmask 7168  }
   0x6   :  { %122 = vmatpush.msra.mxu1 %v24_v6  ;;  %263 = vmatpush.bf16.msra.mxu3 %v963_v46 }
   0x8   :  { %123 = vmatpush.msra.mxu1 %v23_v7  ;;  %v1001_v28 = vpop.eup %1000  ;;  %238 = vmatpush.bf16.msra.mxu2 %v960_v49 }
   0x9   :  { %v139_v29 = vmul.f32 32.0, %v1001_v28  ;;  %vm143_vm6 = vweird.f32 %v1001_v28 }
   0xa   :  { %91 = vperm.xlu1 %983, %v68_v3   ;;  %86 = vperm.xlu0 %982, %v67_v4  }
   0xb   :  { %v140_v30 = vsub.f32 1.0, %v139_v29  ;;  %211 = vmatpush.bf16.msrb.mxu1 %v959_v44  ;;  %264 = vmatpush.bf16.msra.mxu3 %v962_v51  ;;  %v21_v29 = vld [vmem:[%s1380_s2] sm:$0xff] }
   0xd   :  { %v141_v31 = vmul.f32 %v1001_v28, %v140_v30 }
   0xf   :  { %v142_v32 = vadd.f32 %v1001_v28, %v141_v31  ;;  %212 = vmatpush.bf16.msrb.mxu1 %v958_v48  ;;  %v965_v48 = vld [vmem:[%s1381_s3 + $0x38] sm:$0xff] }
  0x10   :  { %357 = vmatpush.bf16.msrb.mxu2 %v965_v48 }
  0x11   :  { %v1109_v33 = vsel %vm143_vm6, %v1001_v28, %v142_v32 }
  0x74   :  { %v75_v9 = vpop.permute.xlu0 %74  ;;  %v78_v11 = vpop.permute.xlu1 %77 }
  0x75   :  { %vm79_vm1 = vcmp.eq.s32.totalorder %v72_v10, %v75_v9  ;;  %vm80_vm4 = vcmp.eq.s32.totalorder %v72_v10, %v78_v11  ;;  %v186_v10 = vperm.slane %v1098_v19, 2 }
  0x76   :  { %v81_v13 = vsel %vm79_vm1, 1.0, %v1037_v12  ;;  %v82_v16 = vsel %vm80_vm4, 1.0, %v1037_v12 }
  0x7c   :  { %v87_v14 = vpop.permute.xlu0 %86  ;;  %v92_v17 = vpop.permute.xlu1 %91 }
  0x7d   :  { %v94_v15 = vsel %vm83_vm2, %v87_v14, %v81_v13  ;;  %v95_v18 = vsel %vm83_vm2, %v92_v17, %v82_v16 }
  0x7e   :  { %869 = vmatmul.msk.f32.vlgmr.msra.gmra.mxu1 %vm97_vm3, %v94_v15 }
  0x86   :  { %870 = vmatmul.msk.f32.gmra.mxu1 %vm97_vm3, %v95_v18 }
  0xfb   :  { %v125_v21 = vpop.f32.mrf.mxu1 }
  0xfc   :  { %v1101_v22 = vadd.f32 %v125_v21, %v96_v20 }
  0xfe   :  { %v132_v23 = vsel %vm131_vm5, %v1101_v22, 0.0 }
  0xff   :  { %133 = vadd.xlane.f32.xlu2 %v132_v23 }
 0x103   :  { %v128_v24 = vpop.f32.mrf.mxu1 }
 0x104   :  { %v1105_v25 = vadd.f32 %v128_v24, %v96_v20 }
 0x106   :  { %v135_v26 = vsel %vm131_vm5, %v1105_v25, 0.0 }
 0x107   :  { %136 = vadd.xlane.f32.xlu2 %v135_v26 }
 0x172   :  { %v134_v34 = vpop.xlane.xlu2 %133 }
 0x173   :  { %v145_v35 = vmul.f32 %v1109_v33, %v134_v34  ;;  %v22_v34 = vld [vmem:[%s1380_s2 + $0x8] sm:$0xff] }
 0x175   :  { %v147_v36 = vsub.f32 %v1101_v22, %v145_v35 }
 0x177   :  { %v149_v37 = vmul.f32 %v147_v36, %v147_v36 }
 0x179   :  { %v151_v38 = vsel %vm131_vm5, %v149_v37, 0.0 }
 0x17a   :  { %152 = vadd.xlane.f32.xlu0 %v151_v38  ;;  %v137_v39 = vpop.xlane.xlu2 %136 }
 0x17b   :  { %v146_v40 = vmul.f32 %v1109_v33, %v137_v39 }
 0x17d   :  { %v148_v41 = vsub.f32 %v1105_v25, %v146_v40 }
 0x17f   :  { %v150_v42 = vmul.f32 %v148_v41, %v148_v41 }
 0x181   :  { %v154_v43 = vsel %vm131_vm5, %v150_v42, 0.0 }
 0x182   :  { %155 = vadd.xlane.f32.xlu1 %v154_v43 }
 0x1ed   :  { %v153_v47 = vpop.xlane.xlu0 %152 }
 0x1ee   :  { %v157_v50 = vmul.f32 %v153_v47, %v1109_v33 }
 0x1f0   :  { %v159_v52 = vadd.f32 1e-05, %v157_v50 }
 0x1f2   :  { %1002 = vrsqrt.f32 %v159_v52  ;;  %vm167_vm8 = vweird.f32 %v159_v52 }
 0x1f5   :  { %v156_v53 = vpop.xlane.xlu1 %155 }
 0x1f6   :  { %v158_v54 = vmul.f32 %v156_v53, %v1109_v33 }
 0x1f8   :  { %v1003_v55 = vpop.eup %1002  ;;  %v160_v56 = vadd.f32 1e-05, %v158_v54 }
 0x1f9   :  { %v162_v57 = vmul.f32 %v1003_v55, %v159_v52  ;;  %vm168_vm7 = vweird.f32 %v1003_v55 }
 0x1fa   :  { %1004 = vrsqrt.f32 %v160_v56  ;;  %vm169_vm9 = vmor %vm167_vm8, %vm168_vm7  ;;  %vm177_vm11 = vweird.f32 %v160_v56 }
 0x1fb   :  { %v163_v58 = vmul.f32 %v1003_v55, %v162_v57 }
 0x1fd   :  { %v164_v59 = vmul.f32 0.5, %v163_v58 }
 0x1ff   :  { %v165_v60 = vsub.f32 1.5, %v164_v59 }
 0x200   :  { %v1005_v61 = vpop.eup %1004 }
 0x201   :  { %v166_v62 = vmul.f32 %v1003_v55, %v165_v60  ;;  %v172_v63 = vmul.f32 %v1005_v61, %v160_v56  ;;  %vm178_vm10 = vweird.f32 %v1005_v61  ;;  %v964_v56 = vld [vmem:[%s1381_s3 + $0x30] sm:$0xff] }
 0x202   :  { %vm179_vm12 = vmor %vm177_vm11, %vm178_vm10  ;;  %358 = vmatpush.bf16.msrb.mxu2 %v964_v56  ;;  %v975_v56 = vld [vmem:[%s1382_s4 + $0x8] sm:$0xff] }
 0x203   :  { %v173_v0 = vmul.f32 %v1005_v61, %v172_v63  ;;  %v170_v1 = vsel %vm169_vm9, %v1003_v55, %v166_v62  ;;  %439 = vmatpush.bf16.msrb.mxu3 %v975_v56 }
 0x204   :  { %v181_v4 = vmul.f32 %v170_v1, %v147_v36 }
 0x205   :  { %v174_v2 = vmul.f32 0.5, %v173_v0 }
 0x206   :  { %v184_v9 = vmul.f32 %v183_v5, %v181_v4  ;;  %v27_v4 = vld [vmem:[%s1380_s2 + $0x30] sm:$0xff] }
 0x207   :  { %v175_v3 = vsub.f32 1.5, %v174_v2  ;;  %v1175_v2 = vld [vmem:[%s1380_s2 + $0x38] sm:$0xff] }
 0x208   :  { %v187_v13 = vadd.f32 %v186_v10, %v184_v9 }
 0x209   :  { %v176_v6 = vmul.f32 %v1005_v61, %v175_v3  ;;  %v70_v3 = vld [vmem:[%s1379_s1 + $0x18] sm:$0xff] }
 0x20a   :  { %vm531_vm14 = vcmp.lt.f32.partialorder %v1175_v2, %v70_v3 }
 0x20b   :  { %v180_v7 = vsel %vm179_vm12, %v1005_v61, %v176_v6  ;;  %v951_v6 = vsel %vm531_vm14, 1.0, %v1037_v12 }
 0x20c   :  { %v182_v8 = vmul.f32 %v180_v7, %v148_v41 }
 0x20e   :  { %v185_v11 = vmul.f32 %v183_v5, %v182_v8  ;;  %v69_v5 = vld [vmem:[%s1379_s1 + $0x10] sm:$0xff]  ;;  %v552_v8 = vsel %vm544_vm0, %v951_v6, 0.0 }
 0x20f   :  { %vm530_vm15 = vcmp.lt.f32.partialorder %v27_v4, %v69_v5 }
 0x210   :  { %v188_v14 = vadd.f32 %v186_v10, %v185_v11  ;;  %v950_v7 = vsel %vm530_vm15, 1.0, %v1037_v12  ;;  %v553_v10 = vrot.slane %v552_v8, 4 }
 0x211   :  { %v545_v11 = vsel %vm544_vm0, %v950_v7, 0.0 }
 0x212   :  { %v189_v15 = vpack.c.bf16 %v188_v14, %v187_v13 }
 0x214   :  { %879 = vmatmul.msk.bf16.vlgmr.msrb.gmra.mxu1 %vm131_vm5, %v189_v15  ;;  %888 = vmatmul.msk.bf16.vlgmr.msra.gmra.mxu2 %vm131_vm5, %v189_v15 }
 0x215   :  { %897 = vmatmul.msk.bf16.vlgmr.msra.gmra.mxu3 %vm131_vm5, %v189_v15  ;;  %v546_v15 = vrot.slane %v545_v11, 4 }
 0x291   :  { %v214_v18 = vpop.f32.mrf.mxu1 }
 0x297   :  { %v240_v16 = vpop.f32.mrf.mxu2 }
 0x298   :  { %v266_v17 = vpop.f32.mrf.mxu3 }
 0x299   :  { %v216_v27 = vpop.f32.mrf.mxu1 }
 0x29a   :  { %v271_v28 = vpack.c.bf16 %v216_v27, %v214_v18 }
 0x29f   :  { %v242_v20 = vpop.f32.mrf.mxu2 }
 0x2a0   :  { %v272_v21 = vpack.c.bf16 %v242_v20, %v240_v16  ;;  %v268_v23 = vpop.f32.mrf.mxu3  ;;  %v554_v16 = vadd.f32 %v553_v10, %v552_v8  ;;  %v547_v20 = vadd.f32 %v546_v15, %v545_v11 }
 0x2a1   :  { %v317_v24 = vpack.c.bf16 %v268_v23, %v266_v17 }
 0x2a2   :  { %v277_v26 = vsel %vm131_vm5, %v272_v21, 0  ;;  %v555_v23 = vrot.slane %v554_v16, 2  ;;  %v548_v27 = vrot.slane %v547_v20, 2 }
 0x2a3   :  { %328 = vmatpush.bf16.msra.mxu1 %v317_v24  ;;  %286 = vmatpush.bf16.xpose.msra.mxu0 %v277_v26 }
 0x2aa   :  { %898 = vmatmul.msk.bf16.vlgmr.msra.gmra.mxu0 %vm131_vm5, %v271_v28  ;;  %v556_v28 = vadd.f32 %v555_v23, %v554_v16 }
 0x327   :  { %v288_v30 = vpop.f32.mrf.mxu0 }
 0x328   :  { %v289_v31 = vadd.f32 %v288_v30, %v21_v29 }
 0x32a   :  { %v294_v32 = vsel %vm293_vm13, %v289_v31, -inf }
 0x32b   :  { %295 = vmax.xlane.f32.xlu2 %v294_v32  ;;  %v557_v32 = vrot.slane %v556_v28, 1 }
 0x32f   :  { %v290_v35 = vpop.f32.mrf.mxu0 }
 0x330   :  { %v291_v36 = vadd.f32 %v290_v35, %v22_v34  ;;  %v558_v35 = vadd.f32 %v557_v32, %v556_v28  ;;  %v411_v28 = vperm.slane %v1098_v19, 3 }
 0x332   :  { %v297_v37 = vsel %vm293_vm13, %v291_v36, -inf  ;;  %vm562_vm2 = vcmp.gt.f32.partialorder %v558_v35, 0.0 }
 0x333   :  { %298 = vmax.xlane.f32.xlu2 %v297_v37  ;;  %v560_v37 = vmax.f32 %v558_v35, 1.0 }
 0x39e   :  { %v296_v38 = vpop.xlane.xlu2 %295 }
 0x39f   :  { %v300_v39 = vsub.f32 %v289_v31, %v296_v38  ;;  %v549_v31 = vadd.f32 %v548_v27, %v547_v20 }
 0x3a1   :  { %v302_v40 = vmul.f32 1.442695, %v300_v39  ;;  %v550_v34 = vrot.slane %v549_v31, 1  ;;  %v957_v39 = vadd.f32 -1.0, %v558_v35 }
 0x3a3   :  { %1006 = vpow2.f32 %v302_v40 }
 0x3a6   :  { %v299_v41 = vpop.xlane.xlu2 %298 }
 0x3a7   :  { %v301_v42 = vsub.f32 %v291_v36, %v299_v41  ;;  %v551_v36 = vadd.f32 %v550_v34, %v549_v31  ;;  %v654_v41 = vmax.f32 %v957_v39, 1.0 }
 0x3a9   :  { %v1007_v43 = vpop.eup %1006  ;;  %v304_v44 = vmul.f32 1.442695, %v301_v42  ;;  %v559_v38 = vmax.f32 %v551_v36, 1.0  ;;  %v956_v40 = vadd.f32 -1.0, %v551_v36  ;;  %vm561_vm1 = vcmp.gt.f32.partialorder %v551_v36, 0.0 }
 0x3aa   :  { %v306_v45 = vsel %vm293_vm13, %v1007_v43, 0.0 }
 0x3ab   :  { %1008 = vpow2.f32 %v304_v44  ;;  %307 = vadd.xlane.f32.xlu2 %v306_v45  ;;  %v653_v42 = vmax.f32 %v956_v40, 1.0  ;;  %v563_v44 = vsel %vm561_vm1, 1.0, %v1037_v12  ;;  %v564_v45 = vsel %vm562_vm2, 1.0, %v1037_v12 }
 0x3b1   :  { %v1009_v46 = vpop.eup %1008 }
 0x3b2   :  { %v309_v47 = vsel %vm293_vm13, %v1009_v46, 0.0 }
 0x3b3   :  { %310 = vadd.xlane.f32.xlu2 %v309_v47  ;;  %v990_v47 = vpack.i.bf16 %v564_v45, %v563_v44 }
 0x41e   :  { %v308_v49 = vpop.xlane.xlu2 %307 }
 0x41f   :  { %1010 = vrcp.f32 %v308_v49  ;;  %v719_v49 = vsub.f32 1.0, %v950_v7 }
 0x425   :  { %v1011_v51 = vpop.eup %1010 }
 0x426   :  { %v311_v50 = vpop.xlane.xlu2 %310  ;;  %v314_v53 = vmul.f32 %v1011_v51, %v1007_v43  ;;  %v720_v43 = vsub.f32 1.0, %v951_v6  ;;  %v953_v51 = vadd.f32 -1.0, %v70_v3 }
 0x427   :  { %1012 = vrcp.f32 %v311_v50  ;;  %v952_v50 = vadd.f32 -1.0, %v69_v5 }
 0x428   :  { %v722_v48 = vmul.f32 1e+30, %v720_v43  ;;  %vm539_vm4 = vcmp.eq.f32.partialorder %v1175_v2, %v953_v51 }
 0x429   :  { %vm538_vm3 = vcmp.eq.f32.partialorder %v27_v4, %v952_v50 }
 0x42d   :  { %v1013_v52 = vpop.eup %1012 }
 0x42e   :  { %v315_v54 = vmul.f32 %v1013_v52, %v1009_v46  ;;  %v985_v46 = vpack.i.bf16 %v951_v6, %v950_v7  ;;  %v721_v52 = vmul.f32 1e+30, %v719_v49 }
 0x430   :  { %v316_v55 = vpack.c.bf16 %v315_v54, %v314_v53  ;;  %v954_v53 = vsel %vm538_vm3, 1.0, %v1037_v12  ;;  %v955_v54 = vsel %vm539_vm4, 1.0, %v1037_v12  ;;  %vm781_vm4 = vcmask 1041409  }
 0x432   :  { %899 = vmatmul.msk.bf16.vlgmr.msra.gmra.mxu1 %vm293_vm13, %v316_v55  ;;  %v995_v55 = vpack.i.bf16 %v955_v54, %v954_v53 }
 0x4af   :  { %v330_v57 = vpop.f32.mrf.mxu1 }
 0x4b7   :  { %v332_v58 = vpop.f32.mrf.mxu1 }
 0x4b8   :  { %v335_v59 = vpack.c.bf16 %v332_v58, %v330_v57 }
 0x4ba   :  { %908 = vmatmul.msk.bf16.vlgmr.msrb.gmra.mxu2 %vm131_vm5, %v335_v59 }
 0x53d   :  { %v360_v60 = vpop.f32.mrf.mxu2 }
 0x53e   :  { %v1163_v61 = vadd.f32 %v360_v60, %v1101_v22  ;;  %v974_v60 = vld [vmem:[%s1382_s4] sm:$0xff]  ;;  %s1039_s4 = smov 64  }
 0x53f   :  { %440 = vmatpush.bf16.msrb.mxu3 %v974_v60 }
 0x540   :  { %v367_v62 = vsel %vm131_vm5, %v1163_v61, 0.0 }
 0x541   :  { %368 = vadd.xlane.f32.xlu2 %v367_v62 }
 0x545   :  { %v362_v63 = vpop.f32.mrf.mxu2 }
 0x546   :  { %v1168_v0 = vadd.f32 %v362_v63, %v1105_v25 }
 0x548   :  { %v370_v1 = vsel %vm131_vm5, %v1168_v0, 0.0 }
 0x549   :  { %371 = vadd.xlane.f32.xlu2 %v370_v1 }
 0x561   :  { %593 = vperm.xlu2 %984, %v559_v38   ;;  %v414_v38 = vperm.slane %v1098_v19, 4 }
 0x569   :  { %662 = vperm.xlu2 %984, %v654_v41  }
 0x571   :  { %991 = vperm.xlu2 %984, %v990_v47  }
 0x5b4   :  { %v369_v9 = vpop.xlane.xlu2 %368 }
 0x5b5   :  { %v373_v13 = vmul.f32 %v369_v9, %v1109_v33 }
 0x5b7   :  { %v1191_v14 = vsub.f32 %v1163_v61, %v373_v13 }
 0x5b9   :  { %v377_v17 = vmul.f32 %v1191_v14, %v1191_v14 }
 0x5bb   :  { %v379_v18 = vsel %vm131_vm5, %v377_v17, 0.0 }
 0x5bc   :  { %380 = vadd.xlane.f32.xlu0 %v379_v18  ;;  %v372_v21 = vpop.xlane.xlu2 %371 }
 0x5bd   :  { %v374_v24 = vmul.f32 %v372_v21, %v1109_v33 }
 0x5bf   :  { %v1198_v26 = vsub.f32 %v1168_v0, %v374_v24 }
 0x5c1   :  { %v378_v29 = vmul.f32 %v1198_v26, %v1198_v26 }
 0x5c3   :  { %v382_v30 = vsel %vm131_vm5, %v378_v29, 0.0 }
 0x5c4   :  { %383 = vadd.xlane.f32.xlu1 %v382_v30  ;;  %v594_v62 = vpop.permute.xlu2 %593 }
 0x5c5   :  { %vm606_vm12 = vweird.f32 %v594_v62  ;;  %v612_v34 = vand.u32 2147483648, %v594_v62  ;;  %v610_v36 = vand.u32 2147483647, %v594_v62 }
 0x5c7   :  { %v613_v44 = vor.u32 1.1754944e-38, %v612_v34  ;;  %vm1255_vm15 = vcmp.eq.f32.partialorder %v610_v36, 8.507059e+37 }
 0x5d0   :  { %598 = vperm.xlu0 %982, %v560_v37  }
 0x5d8   :  { %657 = vperm.xlu0 %982, %v653_v42  }
 0x5dd   :  { %986 = vperm.xlu1 %983, %v985_v46  }
 0x5e0   :  { %730 = vperm.xlu0 %982, %v722_v48  }
 0x5e5   :  { %725 = vperm.xlu1 %983, %v721_v52  }
 0x5ed   :  { %996 = vperm.xlu1 %983, %v995_v55  }
 0x62f   :  { %v381_v57 = vpop.xlane.xlu0 %380 }
 0x630   :  { %v385_v58 = vmul.f32 %v381_v57, %v1109_v33  ;;  %v1266_v57 = vpop.permute.xlu2 %662 }
 0x632   :  { %v387_v59 = vadd.f32 1e-05, %v385_v58 }
 0x634   :  { %1014 = vrsqrt.f32 %v387_v59  ;;  %vm395_vm7 = vweird.f32 %v387_v59 }
 0x635   :  { %1016 = vrcp.f32 %v594_v62 }
 0x637   :  { %v384_v63 = vpop.xlane.xlu1 %383 }
 0x638   :  { %v386_v12 = vmul.f32 %v384_v63, %v1109_v33 }
 0x63a   :  { %v1015_v1 = vpop.eup %1014  ;;  %v388_v2 = vadd.f32 1e-05, %v386_v12 }
 0x63b   :  { %v390_v3 = vmul.f32 %v1015_v1, %v387_v59  ;;  %v1216_v5 = vpop.eup %1016  ;;  %vm396_vm6 = vweird.f32 %v1015_v1 }
 0x63c   :  { %1018 = vrsqrt.f32 %v388_v2  ;;  %v602_v10 = vmul.f32 %v1216_v5, %v594_v62  ;;  %vm397_vm8 = vmor %vm395_vm7, %vm396_vm6  ;;  %vm405_vm10 = vweird.f32 %v388_v2  ;;  %vm607_vm13 = vweird.f32 %v1216_v5 }
 0x63d   :  { %v391_v4 = vmul.f32 %v1015_v1, %v390_v3  ;;  %vm1238_vm14 = vmor %vm606_vm12, %vm607_vm13  ;;  %vm685_vm6 = vweird.f32 %v1266_v57 }
 0x63e   :  { %v603_v15 = vsub.f32 1.0, %v602_v10 }
 0x63f   :  { %v392_v6 = vmul.f32 0.5, %v391_v4 }
 0x640   :  { %v604_v23 = vmul.f32 %v1216_v5, %v603_v15 }
 0x641   :  { %v393_v7 = vsub.f32 1.5, %v392_v6 }
 0x642   :  { %v1019_v8 = vpop.eup %1018  ;;  %v1218_v9 = vpop.permute.xlu0 %598  ;;  %v1234_v32 = vadd.f32 %v1216_v5, %v604_v23 }
 0x643   :  { %v400_v11 = vmul.f32 %v1019_v8, %v388_v2  ;;  %1020 = vrcp.f32 %v1218_v9  ;;  %v394_v13 = vmul.f32 %v1015_v1, %v393_v7  ;;  %vm406_vm9 = vweird.f32 %v1019_v8 }
 0x644   :  { %vm407_vm11 = vmor %vm405_vm10, %vm406_vm9  ;;  %v609_v43 = vsel %vm1238_vm14, %v1216_v5, %v1234_v32  ;;  %1022 = vrcp.f32 %v1266_v57  ;;  %vm621_vm0 = vweird.f32 %v1218_v9  ;;  %v627_v62 = vand.u32 2147483648, %v1218_v9 }
 0x645   :  { %v401_v33 = vmul.f32 %v1019_v8, %v400_v11  ;;  %v398_v17 = vsel %vm397_vm8, %v1015_v1, %v394_v13  ;;  %v614_v36 = vsel %vm1255_vm15, %v613_v44, %v609_v43 }
 0x646   :  { %v409_v24 = vmul.f32 %v398_v17, %v1191_v14  ;;  %v628_v34 = vor.u32 1.1754944e-38, %v627_v62 }
 0x647   :  { %v402_v16 = vmul.f32 0.5, %v401_v33  ;;  %v625_v33 = vand.u32 2147483647, %v1218_v9 }
 0x648   :  { %v412_v37 = vmul.f32 %v411_v28, %v409_v24 }
 0x649   :  { %v1222_v18 = vpop.eup %1020  ;;  %v403_v20 = vsub.f32 1.5, %v402_v16  ;;  %vm626_vm3 = vcmp.eq.f32.partialorder %v625_v33, 8.507059e+37 }
 0x64a   :  { %v1224_v21 = vpop.permute.xlu0 %657  ;;  %v617_v29 = vmul.f32 %v1222_v18, %v1218_v9  ;;  %v415_v51 = vadd.f32 %v414_v38, %v412_v37  ;;  %vm622_vm1 = vweird.f32 %v1222_v18 }
 0x64b   :  { %v404_v27 = vmul.f32 %v1019_v8, %v403_v20  ;;  %1024 = vrcp.f32 %v1224_v21  ;;  %v1280_v20 = vpop.eup %1022  ;;  %vm1286_vm2 = vmor %vm621_vm0, %vm622_vm1 }
 0x64c   :  { %v618_v39 = vsub.f32 1.0, %v617_v29  ;;  %vm686_vm7 = vweird.f32 %v1280_v20 }
 0x64d   :  { %v408_v30 = vsel %vm407_vm11, %v1019_v8, %v404_v27  ;;  %vm1323_vm8 = vmor %vm685_vm6, %vm686_vm7  ;;  %vm670_vm11 = vweird.f32 %v1224_v21  ;;  %vm839_vm6 = vcmask 1041408   ;;  %vm841_vm7 = vcmask 254976  }
 0x64e   :  { %v410_v31 = vmul.f32 %v408_v30, %v1198_v26  ;;  %v619_v49 = vmul.f32 %v1222_v18, %v618_v39  ;;  %v681_v39 = vmul.f32 %v1280_v20, %v1266_v57 }
 0x64f   :  { %v1236_v35 = vpop.permute.xlu1 %986 }
 0x650   :  { %v989_v40 = vunpack.i.h.bf16 %v1236_v35  ;;  %v988_v41 = vunpack.i.l.bf16 %v1236_v35  ;;  %v413_v26 = vmul.f32 %v411_v28, %v410_v31  ;;  %v620_v5 = vadd.f32 %v1222_v18, %v619_v49 }
 0x652   :  { %v576_v42 = vmul.f32 %v989_v40, %v1105_v25  ;;  %v731_v45 = vpop.permute.xlu0 %730  ;;  %v575_v19 = vmul.f32 %v988_v41, %v1101_v22  ;;  %v416_v52 = vadd.f32 %v414_v38, %v413_v26  ;;  %v624_v29 = vsel %vm1286_vm2, %v1222_v18, %v620_v5  ;;  %v992_v26 = vpop.permute.xlu2 %991 }
 0x653   :  { %v734_v47 = vsub.f32 %v1105_v25, %v731_v45  ;;  %v762_v48 = vadd.f32 %v731_v45, %v1105_v25  ;;  %v629_v45 = vsel %vm626_vm3, %v628_v34, %v624_v29  ;;  %v994_v44 = vunpack.i.h.bf16 %v992_v26 }
 0x654   :  { %v584_v50 = vsel %vm131_vm5, %v576_v42, 0.0  ;;  %v577_v54 = vsel %vm131_vm5, %v575_v19, 0.0  ;;  %v417_v12 = vpack.c.bf16 %v416_v52, %v415_v51  ;;  %v1297_v42 = vpop.eup %1024  ;;  %v993_v51 = vunpack.i.l.bf16 %v992_v26 }
 0x655   :  { %v585_v53 = vrot.slane %v584_v50, 4  ;;  %v742_v55 = vsel %vm131_vm5, %v734_v47, -inf  ;;  %v770_v56 = vsel %vm131_vm5, %v762_v48, inf  ;;  %v578_v58 = vrot.slane %v577_v54, 4 }
 0x656   :  { %v743_v59 = vrot.slane %v742_v55, 4  ;;  %v771_v60 = vrot.slane %v770_v56, 4  ;;  %917 = vmatmul.msk.bf16.vlgmr.msrb.gmra.mxu3 %vm131_vm5, %v417_v12  ;;  %v666_v52 = vmul.f32 %v1297_v42, %v1224_v21  ;;  %vm671_vm9 = vweird.f32 %v1297_v42 }
 0x657   :  { %v586_v63 = vadd.f32 %v585_v53, %v584_v50  ;;  %v726_v1 = vpop.permute.xlu1 %725  ;;  %v579_v2 = vadd.f32 %v578_v58, %v577_v54  ;;  %v676_v34 = vand.u32 2147483648, %v1224_v21  ;;  %vm672_vm12 = vmor %vm670_vm11, %vm671_vm9  ;;  %vm803_vm2 = vcmask 523264  }
 0x658   :  { %v744_v3 = vmax.f32 %v742_v55, %v743_v59  ;;  %v772_v4 = vmin.f32 %v770_v56, %v771_v60  ;;  %v733_v7 = vsub.f32 %v1101_v22, %v726_v1  ;;  %v761_v8 = vadd.f32 %v726_v1, %v1101_v22 }
 0x659   :  { %v587_v6 = vrot.slane %v586_v63, 2  ;;  %v580_v10 = vrot.slane %v579_v2, 2  ;;  %v682_v55 = vsub.f32 1.0, %v681_v39  ;;  %vm805_vm3 = vcmask 785408  }
 0x65a   :  { %v745_v11 = vrot.slane %v744_v3, 2  ;;  %v773_v13 = vrot.slane %v772_v4, 2  ;;  %v735_v16 = vsel %vm131_vm5, %v733_v7, -inf  ;;  %v763_v17 = vsel %vm131_vm5, %v761_v8, inf }
 0x65b   :  { %v588_v15 = vadd.f32 %v587_v6, %v586_v63  ;;  %v581_v24 = vadd.f32 %v580_v10, %v579_v2  ;;  %v736_v28 = vrot.slane %v735_v16, 4  ;;  %v764_v32 = vrot.slane %v763_v17, 4 }
 0x65c   :  { %v746_v27 = vmax.f32 %v744_v3, %v745_v11  ;;  %v774_v31 = vmin.f32 %v772_v4, %v773_v13  ;;  %v667_v3 = vsub.f32 1.0, %v666_v52 }
 0x65d   :  { %v589_v30 = vrot.slane %v588_v15, 1  ;;  %v582_v14 = vrot.slane %v581_v24, 1  ;;  %v737_v9 = vmax.f32 %v735_v16, %v736_v28  ;;  %v765_v38 = vmin.f32 %v763_v17, %v764_v32 }
 0x65e   :  { %v747_v47 = vrot.slane %v746_v27, 1  ;;  %v775_v50 = vrot.slane %v774_v31, 1 }
 0x65f   :  { %v590_v37 = vadd.f32 %v589_v30, %v588_v15  ;;  %v583_v18 = vadd.f32 %v582_v14, %v581_v24  ;;  %v738_v19 = vrot.slane %v737_v9, 2  ;;  %v766_v49 = vrot.slane %v765_v38, 2 }
 0x660   :  { %v748_v59 = vmax.f32 %v746_v27, %v747_v47  ;;  %v776_v12 = vmin.f32 %v774_v31, %v775_v50  ;;  %v691_v15 = vand.u32 2147483648, %v1266_v57  ;;  %v689_v24 = vand.u32 2147483647, %v1266_v57 }
 0x661   :  { %v630_v48 = vmul.f32 %v629_v45, %v590_v37  ;;  %v615_v46 = vmul.f32 %v614_v36, %v583_v18  ;;  %v739_v43 = vmax.f32 %v737_v9, %v738_v19  ;;  %v767_v54 = vmin.f32 %v765_v38, %v766_v49 }
 0x662   :  { %v760_v6 = vmul.f32 %v994_v44, %v748_v59  ;;  %v778_v10 = vmul.f32 %v994_v44, %v776_v12  ;;  %v692_v32 = vor.u32 1.1754944e-38, %v691_v15  ;;  %vm690_vm10 = vcmp.eq.f32.partialorder %v689_v24, 8.507059e+37 }
 0x663   :  { %v632_v53 = vsub.f32 %v1105_v25, %v630_v48  ;;  %v631_v56 = vsub.f32 %v1101_v22, %v615_v46  ;;  %v740_v58 = vrot.slane %v739_v43, 1  ;;  %v1304_v60 = vsel %vm781_vm4, %v630_v48, %v615_v46 }
 0x664   :  { %v768_v63 = vrot.slane %v767_v54, 1  ;;  %v683_v22 = vmul.f32 %v1280_v20, %v682_v55  ;;  %v674_v57 = vand.u32 2147483647, %v1224_v21  ;;  %v677_v45 = vor.u32 1.1754944e-38, %v676_v34 }
 0x665   :  { %v634_v62 = vmul.f32 %v989_v40, %v632_v53  ;;  %v633_v1 = vmul.f32 %v988_v41, %v631_v56  ;;  %v741_v2 = vmax.f32 %v739_v43, %v740_v58  ;;  %v668_v41 = vmul.f32 %v1297_v42, %v667_v3 }
 0x666   :  { %v769_v4 = vmin.f32 %v767_v54, %v768_v63  ;;  %v684_v23 = vadd.f32 %v1280_v20, %v683_v22  ;;  %vm675_vm13 = vcmp.eq.f32.partialorder %v674_v57, 8.507059e+37  ;;  %v970_v22 = vld [vmem:[%s1381_s3 + $0x60] sm:$0xff] }
 0x667   :  { %v636_v25 = vmul.f32 %v634_v62, %v634_v62  ;;  %v635_v5 = vmul.f32 %v633_v1, %v633_v1  ;;  %v759_v7 = vmul.f32 %v993_v51, %v741_v2  ;;  %v669_v30 = vadd.f32 %v1297_v42, %v668_v41 }
 0x668   :  { %v777_v40 = vmul.f32 %v993_v51, %v769_v4  ;;  %v688_v36 = vsel %vm1323_vm8, %v1280_v20, %v684_v23  ;;  %v972_v4 = vld [vmem:[%s1381_s3 + $0x70] sm:$0xff] }
 0x669   :  { %v644_v8 = vsel %vm131_vm5, %v636_v25, 0.0  ;;  %v637_v13 = vsel %vm131_vm5, %v635_v5, 0.0  ;;  %v792_v35 = vsel %vm781_vm4, %v760_v6, %v759_v7  ;;  %v673_v38 = vsel %vm672_vm12, %v1297_v42, %v669_v30  ;;  %v973_v25 = vld [vmem:[%s1381_s3 + $0x78] sm:$0xff]  ;;  %v971_v5 = vld [vmem:[%s1381_s3 + $0x68] sm:$0xff]  ;;  %v968_v7 = vld [vmem:[%s1381_s3 + $0x50] sm:$0xff] }
 0x66a   :  { %v645_v11 = vrot.slane %v644_v8, 4  ;;  %v638_v33 = vrot.slane %v637_v13, 4  ;;  %793 = vrot.lane.b32.xlu2 %v792_v35, %s1039_s4  ;;  %v798_v16 = vsel %vm781_vm4, %v778_v10, %v777_v40  ;;  %v693_v26 = vsel %vm690_vm10, %v692_v32, %v688_v36  ;;  %514 = vmatpush.bf16.msrb.mxu0 %v973_v25  ;;  %v969_v6 = vld [vmem:[%s1381_s3 + $0x58] sm:$0xff]  ;;  %v966_v10 = vld [vmem:[%s1381_s3 + $0x40] sm:$0xff] }
 0x66b   :  { %799 = vrot.lane.b32.xlu1 %v798_v16, %s1040_s12  ;;  %v678_v47 = vsel %vm675_vm13, %v677_v45, %v673_v38 }
 0x66c   :  { %v646_v17 = vadd.f32 %v645_v11, %v644_v8  ;;  %v639_v27 = vadd.f32 %v638_v33, %v637_v13  ;;  %v967_v8 = vld [vmem:[%s1381_s3 + $0x48] sm:$0xff] }
 0x66e   :  { %v647_v29 = vrot.slane %v646_v17, 2  ;;  %v640_v31 = vrot.slane %v639_v27, 2  ;;  %515 = vmatpush.bf16.msrb.mxu0 %v972_v4 }
 0x670   :  { %v648_v14 = vadd.f32 %v647_v29, %v646_v17  ;;  %v641_v9 = vadd.f32 %v640_v31, %v639_v27 }
 0x672   :  { %v649_v37 = vrot.slane %v648_v14, 1  ;;  %v642_v39 = vrot.slane %v641_v9, 1  ;;  %516 = vmatpush.bf16.msrb.mxu0 %v971_v5 }
 0x674   :  { %v650_v18 = vadd.f32 %v649_v37, %v648_v14  ;;  %v643_v19 = vadd.f32 %v642_v39, %v641_v9  ;;  %v997_v9 = vpop.permute.xlu1 %996 }
 0x675   :  { %v998_v38 = vunpack.i.l.bf16 %v997_v9 }
 0x676   :  { %v694_v48 = vmul.f32 %v693_v26, %v650_v18  ;;  %v679_v49 = vmul.f32 %v678_v47, %v643_v19  ;;  %517 = vmatpush.bf16.msrb.mxu0 %v970_v22 }
 0x678   :  { %1026 = vrsqrt.f32 %v694_v48  ;;  %vm714_vm14 = vcmp.eq.f32.partialorder %v694_v48, inf  ;;  %v717_v59 = vand.u32 2147483648, %v694_v48  ;;  %vm702_vm15 = vcmp.eq.f32.partialorder %v679_v49, inf }
 0x679   :  { %1028 = vrsqrt.f32 %v679_v49  ;;  %v705_v62 = vand.u32 2147483648, %v679_v49  ;;  %vm716_vm0 = vcmp.eq.f32.partialorder %v694_v48, 0.0  ;;  %vm704_vm1 = vcmp.eq.f32.partialorder %v679_v49, 0.0 }
 0x67a   :  { %518 = vmatpush.bf16.msrb.mxu0 %v969_v6 }
 0x67e   :  { %v1027_v20 = vpop.eup %1026  ;;  %519 = vmatpush.bf16.msrb.mxu0 %v968_v7 }
 0x67f   :  { %v1029_v50 = vpop.eup %1028  ;;  %v708_v46 = vmul.f32 %v1027_v20, %v694_v48 }
 0x680   :  { %v696_v21 = vmul.f32 %v1029_v50, %v679_v49 }
 0x681   :  { %v709_v43 = vmul.f32 %v1027_v20, %v708_v46 }
 0x682   :  { %v697_v44 = vmul.f32 %v1029_v50, %v696_v21  ;;  %520 = vmatpush.bf16.msrb.mxu0 %v967_v8 }
 0x683   :  { %v710_v51 = vmul.f32 0.5, %v709_v43 }
 0x684   :  { %v698_v52 = vmul.f32 0.5, %v697_v44 }
 0x685   :  { %v711_v42 = vsub.f32 1.5, %v710_v51 }
 0x686   :  { %v699_v53 = vsub.f32 1.5, %v698_v52  ;;  %521 = vmatpush.bf16.msrb.mxu0 %v966_v10 }
 0x687   :  { %v712_v54 = vmul.f32 %v1027_v20, %v711_v42 }
 0x688   :  { %v700_v55 = vmul.f32 %v1029_v50, %v699_v53 }
 0x689   :  { %v713_v56 = vmul.f32 %v712_v54, %v694_v48 }
 0x68a   :  { %v701_v58 = vmul.f32 %v700_v55, %v679_v49 }
 0x68b   :  { %v715_v63 = vsel %vm714_vm14, %v694_v48, %v713_v56  ;;  %v999_v48 = vunpack.i.h.bf16 %v997_v9 }
 0x68c   :  { %v703_v12 = vsel %vm702_vm15, %v679_v49, %v701_v58  ;;  %v718_v1 = vsel %vm716_vm0, %v717_v59, %v715_v63 }
 0x68d   :  { %v706_v2 = vsel %vm704_vm1, %v705_v62, %v703_v12 }
 0x68e   :  { %v786_v3 = vsel %vm781_vm4, %v718_v1, %v706_v2 }
 0x68f   :  { %787 = vrot.lane.b32.xlu0 %v786_v3, %s1041_s13 }
 0x6c4   :  { %v794_v52 = vpop.permute.xlu2 %793 }
 0x6d9   :  { %v442_v40 = vpop.f32.mrf.mxu3 }
 0x6da   :  { %v447_v11 = vmul.f32 %v442_v40, %v442_v40 }
 0x6dc   :  { %v449_v13 = vmul.f32 %v447_v11, %v442_v40 }
 0x6dd   :  { %v800_v56 = vpop.permute.xlu1 %799 }
 0x6de   :  { %v451_v35 = vmul.f32 0.044715, %v449_v13 }
 0x6e0   :  { %v453_v41 = vadd.f32 %v451_v35, %v442_v40 }
 0x6e1   :  { %v444_v33 = vpop.f32.mrf.mxu3 }
 0x6e2   :  { %v455_v15 = vmul.f32 0.7978846, %v453_v41  ;;  %v448_v16 = vmul.f32 %v444_v33, %v444_v33 }
 0x6e4   :  { %v450_v17 = vmul.f32 %v448_v16, %v444_v33  ;;  %1030 = vtanh.f32 %v455_v15 }
 0x6e6   :  { %v452_v23 = vmul.f32 0.044715, %v450_v17 }
 0x6e8   :  { %v454_v24 = vadd.f32 %v452_v23, %v444_v33 }
 0x6ea   :  { %v456_v27 = vmul.f32 0.7978846, %v454_v24  ;;  %v1031_v28 = vpop.eup %1030 }
 0x6eb   :  { %v459_v29 = vadd.f32 1.0, %v1031_v28 }
 0x6ec   :  { %1032 = vtanh.f32 %v456_v27 }
 0x6ed   :  { %v461_v31 = vmul.f32 0.5, %v459_v29 }
 0x6ef   :  { %v463_v14 = vmul.f32 %v461_v31, %v442_v40 }
 0x6f2   :  { %v1033_v30 = vpop.eup %1032 }
 0x6f3   :  { %v460_v32 = vadd.f32 1.0, %v1033_v30 }
 0x6f5   :  { %v462_v34 = vmul.f32 0.5, %v460_v32 }
 0x6f7   :  { %v464_v36 = vmul.f32 %v462_v34, %v444_v33 }
 0x6f9   :  { %v465_v57 = vpack.c.bf16 %v464_v36, %v463_v14 }
 0x6fb   :  { %522 = vmatmul.bf16.vlgmr.msrb.gmra.mxu0 %v465_v57 }
 0x701   :  { %v788_v46 = vpop.permute.xlu0 %787 }
 0x702   :  { %v802_v44 = vsel %vm131_vm5, %v1304_v60, %v788_v46 }
 0x703   :  { %v804_v53 = vsel %vm803_vm2, %v802_v44, %v794_v52 }
 0x704   :  { %v806_v58 = vsel %vm805_vm3, %v804_v53, %v800_v56 }
 0x705   :  { %v837_v63 = vmul.f32 %v806_v58, %v806_v58 }
 0x707   :  { %v840_v60 = vsel %vm839_vm6, %v837_v63, 0.0 }
 0x778   :  { %v523_v37 = vpop.f32.mrf.mxu0 }
 0x779   :  { %v528_v39 = vadd.f32 %v523_v37, %v1163_v61 }
 0x77b   :  { %v817_v26 = vmul.f32 %v998_v38, %v528_v39 }
 0x77d   :  { %v819_v45 = vsel %vm131_vm5, %v817_v26, 0.0 }
 0x77e   :  { %v820_v18 = vrot.slane %v819_v45, 4 }
 0x780   :  { %v821_v19 = vadd.f32 %v820_v18, %v819_v45  ;;  %v525_v47 = vpop.f32.mrf.mxu0 }
 0x781   :  { %v529_v49 = vadd.f32 %v525_v47, %v1168_v0 }
 0x782   :  { %v822_v50 = vrot.slane %v821_v19, 2 }
 0x783   :  { %v818_v20 = vmul.f32 %v999_v48, %v529_v49 }
 0x784   :  { %v823_v61 = vadd.f32 %v822_v50, %v821_v19 }
 0x785   :  { %v826_v21 = vsel %vm131_vm5, %v818_v20, 0.0 }
 0x786   :  { %v827_v43 = vrot.slane %v826_v21, 4  ;;  %v824_v54 = vrot.slane %v823_v61, 1 }
 0x788   :  { %v828_v51 = vadd.f32 %v827_v43, %v826_v21  ;;  %v825_v59 = vadd.f32 %v824_v54, %v823_v61 }
 0x78a   :  { %v829_v42 = vrot.slane %v828_v51, 2 }
 0x78c   :  { %v830_v55 = vadd.f32 %v829_v42, %v828_v51 }
 0x78e   :  { %v831_v0 = vrot.slane %v830_v55, 1 }
 0x790   :  { %v832_v62 = vadd.f32 %v831_v0, %v830_v55 }
 0x792   :  { %v835_v12 = vsel %vm781_vm4, %v832_v62, %v825_v59 }
 0x793   :  { %v838_v1 = vmul.f32 %v835_v12, %v835_v12 }
 0x795   :  { %v842_v2 = vsel %vm841_vm7, %v838_v1, 0.0 }
 0x796   :  { %v843_v3 = vadd.f32 %v842_v2, %v840_v60 }
 0x798   :  { %844 = vadd.xlane.f32.xlu0 %v843_v3 }
 0x80b   :  { %v845_v25 = vpop.xlane.xlu0 %844 }
 0x80c   :  { %v846_v4 = vadd.f32 1e-09, %v845_v25 }
 0x80e   :  { %1034 = vrsqrt.f32 %v846_v4  ;;  %vm853_vm9 = vweird.f32 %v846_v4 }
 0x814   :  { %v1035_v5 = vpop.eup %1034 }
 0x815   :  { %v848_v22 = vmul.f32 %v1035_v5, %v846_v4  ;;  %vm854_vm8 = vweird.f32 %v1035_v5 }
 0x816   :  { %vm855_vm4 = vmor %vm853_vm9, %vm854_vm8 }
 0x817   :  { %v849_v6 = vmul.f32 %v1035_v5, %v848_v22 }
 0x819   :  { %v850_v7 = vmul.f32 0.5, %v849_v6 }
 0x81b   :  { %v851_v8 = vsub.f32 1.5, %v850_v7 }
 0x81d   :  { %v852_v10 = vmul.f32 %v1035_v5, %v851_v8 }
 0x81f   :  { %v856_v40 = vsel %vm855_vm4, %v1035_v5, %v852_v10 }
 0x820   :  { %v857_v11 = vmul.f32 %v856_v40, %v806_v58  ;;  %v858_v13 = vmul.f32 %v856_v40, %v835_v12 }
 0x822   :  { %v859_v35 = vsel %vm131_vm5, %v858_v13, 0.0  ;;  %v860_v41 = vsel %vm839_vm6, %v857_v11, 0.0 }
 0x823   :  { %v861_v33 = vsel %vm839_vm6, %v859_v35, 0.0  ;;  %862 = vst [vmem:[%s1383_s5] sm:$0xff] %v860_v41 }
 0x824   :  { %863 = vst [vmem:[%s1383_s5 + $0x8] sm:$0xff] %v861_v33 }

</bundles_post_ra>
